<compile_context>
chip_gen: v7x
topology: tpu7x:2x2x1
jax: 0.10.0
libtpu: 0.0.40
codegen_flags: <defaults>
</compile_context>

<pallas_src>
import functools

import jax
import jax.numpy as jnp
from jax.experimental import pallas as pl
from jax.experimental.pallas import tpu as pltpu

EPS = 1e-6
_TILE_ROWS_MAX = 2048
_TARGET_GRID_STEPS = 16          # >= 8 steps per TensorCore on v7x megacore
_MIN_PIPELINED_TILE = 256        # 512-row tiles already hit ~85% of HBM roofline


def _vmem_budgets():
    """(io_budget_bytes, vmem_limit_bytes), sized to this generation's VMEM."""
    cap = 64 * 1024 * 1024  # conservative fallback (v7x per-TC VMEM)
    try:
        info = pltpu.get_tpu_info()
        cap = int(getattr(info, "vmem_capacity_bytes", cap))
    except Exception:
        pass
    io_budget = cap // 4                         # ~16 MiB v7x, ~32 MiB v5e/v6e
    vmem_limit = min(cap // 2, 96 * 1024 * 1024) # raise v5e's 16 MiB scoped default
    return io_budget, vmem_limit


def _choose_tile_rows(rows, d, dtype_bytes, io_budget):
    """Row-tile size: fits the VMEM budget, keeps the pipeline fed, sublane-aligned."""
    align = max(8, 32 // max(dtype_bytes, 1))    # 8 for f32, 16 for bf16, 32 for int8
    # Per-row footprint: in + out tiles, double-buffered (2 arrays x 2 buffers),
    # plus the materialized f32 upcast temp (~2 f32 copies of the tile live).
    per_row_bytes = 4 * d * dtype_bytes + 2 * d * 4
    cap = max(align, io_budget // per_row_bytes)
    cap = min(cap, _TILE_ROWS_MAX)
    # Enough grid steps for double-buffering + megacore, without tiny tiles.
    tile = min(cap, max(_MIN_PIPELINED_TILE, -(-rows // _TARGET_GRID_STEPS)))
    if tile >= rows:
        return int(rows)                         # single full-extent block
    tile = max(align, (tile // align) * align)
    return int(tile)


def _layernorm_kernel(d_actual, alpha_ref, bias_ref, x_ref, o_ref):
    # alpha_ref / bias_ref: (1, 1) scalars in SMEM (scalar prefetch).
    # x_ref / o_ref: (tile_rows, d_actual) VMEM tiles (last dim = full d_model).
    x = x_ref[...].astype(jnp.float32)

    inv_n = jnp.float32(1.0 / d_actual)
    mean = jnp.sum(x, axis=-1, keepdims=True) * inv_n
    centered = x - mean
    # Two-pass, cancellation-free unbiased variance (matches torch.std, ddof=1).
    inv_nm1 = jnp.float32(1.0 / max(d_actual - 1, 1))
    var = jnp.sum(centered * centered, axis=-1, keepdims=True) * inv_nm1
    std = jnp.sqrt(var)

    alpha = alpha_ref[0, 0]
    bias = bias_ref[0, 0]
    scale = alpha / (std + jnp.float32(EPS))     # (tile, 1): exact divide, HBM-bound anyway
    o_ref[...] = (centered * scale + bias).astype(o_ref.dtype)


@functools.partial(jax.jit, static_argnames=("tile_rows", "d_actual", "vmem_limit"))
def _layer_norm_call(x2d, alpha, bias, *, tile_rows, d_actual, vmem_limit):
    rows, d = x2d.shape
    grid = (pl.cdiv(rows, tile_rows),)           # partial last tile handled by Pallas masking
    kernel = functools.partial(_layernorm_kernel, d_actual)

    return pl.pallas_call(
        kernel,
        out_shape=jax.ShapeDtypeStruct((rows, d), x2d.dtype),
        grid_spec=pltpu.PrefetchScalarGridSpec(
            num_scalar_prefetch=2,               # alpha, bias land in SMEM
            grid=grid,
            in_specs=[
                pl.BlockSpec((tile_rows, d), lambda i, a_ref, b_ref: (i, 0)),
            ],
            out_specs=pl.BlockSpec((tile_rows, d), lambda i, a_ref, b_ref: (i, 0)),
        ),
        compiler_params=pltpu.CompilerParams(
            dimension_semantics=("parallel",),
            vmem_limit_bytes=vmem_limit,
        ),
    )(alpha, bias, x2d)


def encoder_forward(x, mask, alpha, bias, layers=()):
    """Mirrors Encoder.forward: apply each layer(x, mask), then LayerNormalization."""
    for layer in layers:
        x = layer(x, mask)

    B, S, D = x.shape
    rows = B * S
    x2d = x.reshape(rows, D)

    io_budget, vmem_limit = _vmem_budgets()
    tile_rows = _choose_tile_rows(rows, D, jnp.dtype(x2d.dtype).itemsize, io_budget)

    a = jnp.asarray(alpha, jnp.float32).reshape(1, 1)
    b = jnp.asarray(bias, jnp.float32).reshape(1, 1)
    out2d = _layer_norm_call(
        x2d, a, b, tile_rows=tile_rows, d_actual=D, vmem_limit=vmem_limit
    )
    return out2d.reshape(B, S, D)


def _reference(x, alpha, bias):
    mean = jnp.mean(x, axis=-1, keepdims=True)
    d = x.shape[-1]
    var = jnp.sum((x - mean) ** 2, axis=-1, keepdims=True) / max(d - 1, 1)
    std = jnp.sqrt(var)
    return alpha * (x - mean) / (std + EPS) + bias


if __name__ == "__main__":
    key = jax.random.PRNGKey(0)
    batch, seq, d_model = 2, 8, 32

    kx, _ = jax.random.split(key)
    x = jax.random.normal(kx, (batch, seq, d_model), dtype=jnp.float32)
    # mask is accepted (as in the PyTorch forward) but unused with no layers.
    mask = jnp.ones((batch, 1, seq, seq), dtype=jnp.float32)

    # Deterministic parameter init matching nn.Parameter(torch.ones(1)/zeros(1)).
    alpha = jnp.ones((1,), jnp.float32)
    bias = jnp.zeros((1,), jnp.float32)

    out = encoder_forward(x, mask, alpha, bias)
    out = jax.block_until_ready(out)

    ref = _reference(x, alpha[0], bias[0])
    assert out.shape == (batch, seq, d_model)
    assert jnp.allclose(out, ref, atol=1e-4, rtol=1e-4), "mismatch vs reference"

    print("KERNEL_OK")
</pallas_src>

<mosaic_0001>
module attributes {stable_mosaic.version = 11 : i64} {
  func.func @_layernorm_kernel(%arg0: i32, %arg1: memref<1x1xf32, #tpu.memory_space<smem>>, %arg2: memref<1x1xf32, #tpu.memory_space<smem>>, %arg3: memref<16x32xf32, #tpu.memory_space<vmem>>, %arg4: memref<16x32xf32, #tpu.memory_space<vmem>>) attributes {dimension_semantics = [#tpu.dimension_semantics<parallel>], iteration_bounds = array<i64: 1>, scalar_prefetch = 2 : i64, scratch_operands = 0 : i64, tpu.core_type = #tpu.core_type<tc>, window_params = [{transform_indices = @transform_0, window_bounds = array<i64: 16, 32>}, {transform_indices = @transform_1, window_bounds = array<i64: 16, 32>}]} {
    %c0 = arith.constant 0 : index
    %c0_0 = arith.constant 0 : index
    %0 = vector.load %arg3[%c0, %c0_0] : memref<16x32xf32, #tpu.memory_space<vmem>>, vector<16x32xf32>
    %cst = arith.constant dense<0.000000e+00> : vector<16xf32>
    %1 = vector.multi_reduction <add>, %0, %cst [1] : vector<16x32xf32> to vector<16xf32>
    %2 = vector.shape_cast %1 : vector<16xf32> to vector<16x1xf32>
    %cst_1 = arith.constant 3.125000e-02 : f32
    %3 = vector.broadcast %cst_1 : f32 to vector<16x1xf32>
    %4 = arith.mulf %2, %3 : vector<16x1xf32>
    %5 = vector.broadcast %4 : vector<16x1xf32> to vector<16x32xf32>
    %6 = arith.subf %0, %5 : vector<16x32xf32>
    %7 = arith.mulf %6, %6 : vector<16x32xf32>
    %cst_2 = arith.constant dense<0.000000e+00> : vector<16xf32>
    %8 = vector.multi_reduction <add>, %7, %cst_2 [1] : vector<16x32xf32> to vector<16xf32>
    %9 = vector.shape_cast %8 : vector<16xf32> to vector<16x1xf32>
    %cst_3 = arith.constant 0.0322580636 : f32
    %10 = vector.broadcast %cst_3 : f32 to vector<16x1xf32>
    %11 = arith.mulf %9, %10 : vector<16x1xf32>
    %12 = math.sqrt %11 : vector<16x1xf32>
    %c0_4 = arith.constant 0 : index
    %c0_5 = arith.constant 0 : index
    %13 = memref.load %arg1[%c0_4, %c0_5] : memref<1x1xf32, #tpu.memory_space<smem>>
    %c0_6 = arith.constant 0 : index
    %c0_7 = arith.constant 0 : index
    %14 = memref.load %arg2[%c0_6, %c0_7] : memref<1x1xf32, #tpu.memory_space<smem>>
    %cst_8 = arith.constant 9.99999997E-7 : f32
    %15 = vector.broadcast %cst_8 : f32 to vector<16x1xf32>
    %16 = arith.addf %12, %15 : vector<16x1xf32>
    %17 = vector.broadcast %13 : f32 to vector<16x1xf32>
    %18 = arith.divf %17, %16 : vector<16x1xf32>
    %19 = vector.broadcast %18 : vector<16x1xf32> to vector<16x32xf32>
    %20 = arith.mulf %6, %19 : vector<16x32xf32>
    %21 = vector.broadcast %14 : f32 to vector<16x32xf32>
    %22 = arith.addf %20, %21 : vector<16x32xf32>
    %c0_9 = arith.constant 0 : index
    %c0_10 = arith.constant 0 : index
    %23 = vector.load %arg4[%c0_9, %c0_10] : memref<16x32xf32, #tpu.memory_space<vmem>>, vector<16x32xf32>
    tpu.vector_store %arg4[%c0_9, %c0_10], %22 {strides = array<i32>} : memref<16x32xf32, #tpu.memory_space<vmem>>, vector<16x32xf32>,
    return
  }
  func.func @transform_0(%arg0: i32, %arg1: memref<1x1xf32, #tpu.memory_space<smem>>, %arg2: memref<1x1xf32, #tpu.memory_space<smem>>) -> (i32, i32) {
    %c0_i32 = arith.constant 0 : i32
    %c0_i32_0 = arith.constant 0 : i32
    return %arg0, %c0_i32 : i32, i32
  }
  func.func @transform_1(%arg0: i32, %arg1: memref<1x1xf32, #tpu.memory_space<smem>>, %arg2: memref<1x1xf32, #tpu.memory_space<smem>>) -> (i32, i32) {
    %c0_i32 = arith.constant 0 : i32
    %c0_i32_0 = arith.constant 0 : i32
    return %arg0, %c0_i32 : i32, i32
  }
}

</mosaic_0001>

<bundles_post_ra>
// kernel: _layer_norm_call.1
= control target key start
LH: loop header
LB: loop body
LE: loop exit
PB: predicated region body
PF: predicated region fallthrough
CT: control target
= control target key end

     0   :  { %10 = vsyncpa [#allocation6], 0  ;;  %s223_s0 = inlined_call_operand.<no memory space> [shape: f32[1,1], index: 0, kind: input, shape index: {}]   ;;  %s224_s1 = inlined_call_operand.<no memory space> [shape: f32[1,1], index: 1, kind: input, shape index: {}]   ;;  %s225_s2 = inlined_call_operand.hbm [shape: f32[16,32], index: 2, kind: input, shape index: {}]   ;;  %s226_s3 = inlined_call_operand.hbm [shape: f32[16,32], index: 3, kind: output, shape index: {}]  }
   0x1   :  { %11 = vsyncpa [#allocation7], 0  ;;  %s157_s12 = smov [#allocation5]   ;;  %s109_s16 = scalar_lea.hbm %s225_s2, 256 }
   0x2   :  { %s17_s13 = sshll.u32 %s157_s12, 4  ;;  %p110_p0 = scmp.ne.s32.totalorder %s225_s2, %s109_s16  ;;  %s18_s13 = int_to_ptr.vmem [resolvable:$true] %s17_s13 }
   0x3   :  { %p113_p1 = scmp.lt.u32.totalorder %s109_s16, %s225_s2 }
   0x5   :  { %p115_p2 = pnand %p113_p1, %p110_p0 }
   0x7   :  { %118 = shalt.err (!%p115_p2)
}
   0x8   :  { %s119_s21 = scalar_lea.vmem %s18_s13, 256  ;;  %p124_p4 = scmp.lt.s32.totalorder %s18_s13, %s18_s13 }
   0x9   :  { %p120_p3 = scmp.ne.s32.totalorder %s18_s13, %s119_s21  ;;  %p125_p5 = scmp.lt.s32.totalorder %s119_s21, %s119_s21 }
   0xb   :  { %p126_p6 = por %p125_p5, %p124_p4 }
   0xd   :  { %p127_p7 = pnand %p126_p6, %p120_p3 }
   0xf   :  { %130 = shalt.err (!%p127_p7)
}
  0x10   :  { %s158_s22 = smov 128   ;;  %s159_s23 = smov 8  }
  0x11   :  { %23 = dma.hbm_to_vmem [thread:$0]  %s225_s2, 256, %s18_s13, [#allocation6], %s158_s22, %s158_s22, %s159_s23  }
  0x12   :  { %153 = dma.done.wait [#allocation6], 256  }
  0x13   :  { %154 = vsyncadd [#allocation6], 4294967040  ;;  %vm29_vm0 = vcmask 261120   ;;  %v27_v0 = vld [vmem:[#allocation5] sm:$0xff]  ;;  %v28_v1 = vld [vmem:[#allocation5 + $0x8] sm:$0xff]  ;;  %v68_v30 = vstv %s223_s0  ;;  %v75_v33 = vstv %s224_s1  ;;  %s160_s29 = smov [#allocation8]  }
  0x14   :  { %v30_v2 = vsel %vm29_vm0, %v27_v0, 0.0  ;;  %v33_v3 = vsel %vm29_vm0, %v28_v1, 0.0  ;;  %s85_s30 = sshll.u32 %s160_s29, 4  ;;  %s86_s30 = int_to_ptr.vmem [resolvable:$true] %s85_s30 }
  0x15   :  { %31 = vadd.xlane.f32.xlu0 %v30_v2  ;;  %s131_s0 = scalar_lea.vmem %s86_s30, 256  ;;  %p136_p9 = scmp.lt.s32.totalorder %s86_s30, %s86_s30 }
  0x16   :  { %p132_p8 = scmp.ne.s32.totalorder %s86_s30, %s131_s0  ;;  %p137_p10 = scmp.lt.s32.totalorder %s131_s0, %s131_s0 }
  0x18   :  { %p138_p11 = por %p137_p10, %p136_p9 }
  0x19   :  { %34 = vadd.xlane.f32.xlu0 %v33_v3 }
  0x1a   :  { %p139_p12 = pnand %p138_p11, %p132_p8 }
  0xa2   :  { %v32_v4 = vpop.xlane.xlu0 %31 }
  0xa3   :  { %v36_v5 = vmul.f32 0.03125, %v32_v4 }
  0xa5   :  { %v38_v6 = vsub.f32 %v27_v0, %v36_v5 }
  0xa6   :  { %v35_v7 = vpop.xlane.xlu0 %34 }
  0xa7   :  { %v37_v8 = vmul.f32 0.03125, %v35_v7  ;;  %v40_v9 = vmul.f32 %v38_v6, %v38_v6 }
  0xa9   :  { %v39_v10 = vsub.f32 %v28_v1, %v37_v8  ;;  %v42_v11 = vsel %vm29_vm0, %v40_v9, 0.0 }
  0xaa   :  { %43 = vadd.xlane.f32.xlu1 %v42_v11 }
  0xab   :  { %v41_v12 = vmul.f32 %v39_v10, %v39_v10 }
  0xad   :  { %v45_v13 = vsel %vm29_vm0, %v41_v12, 0.0 }
  0xae   :  { %46 = vadd.xlane.f32.xlu1 %v45_v13 }
 0x137   :  { %v44_v14 = vpop.xlane.xlu1 %43 }
 0x138   :  { %v48_v15 = vmul.f32 0.032258064, %v44_v14 }
 0x13a   :  { %101 = vrsqrt.f32 %v48_v15  ;;  %vm52_vm1 = vcmp.eq.f32.partialorder %v48_v15, inf  ;;  %v55_v20 = vand.u32 2147483648, %v48_v15  ;;  %vm54_vm2 = vcmp.eq.f32.partialorder %v48_v15, 0.0 }
 0x13b   :  { %v47_v16 = vpop.xlane.xlu1 %46 }
 0x13c   :  { %v49_v17 = vmul.f32 0.032258064, %v47_v16 }
 0x13e   :  { %103 = vrsqrt.f32 %v49_v17  ;;  %vm59_vm3 = vcmp.eq.f32.partialorder %v49_v17, inf  ;;  %v62_v26 = vand.u32 2147483648, %v49_v17  ;;  %vm61_vm4 = vcmp.eq.f32.partialorder %v49_v17, 0.0 }
 0x144   :  { %v102_v18 = vpop.eup %101 }
 0x145   :  { %v51_v19 = vmul.f32 %v102_v18, %v48_v15 }
 0x147   :  { %v53_v21 = vsel %vm52_vm1, %v48_v15, %v51_v19 }
 0x148   :  { %v104_v22 = vpop.eup %103  ;;  %v56_v23 = vsel %vm54_vm2, %v55_v20, %v53_v21 }
 0x149   :  { %v66_v24 = vadd.f32 1e-06, %v56_v23  ;;  %v58_v25 = vmul.f32 %v104_v22, %v49_v17 }
 0x14b   :  { %105 = vrcp.f32 %v66_v24  ;;  %v60_v27 = vsel %vm59_vm3, %v49_v17, %v58_v25 }
 0x14c   :  { %v63_v28 = vsel %vm61_vm4, %v62_v26, %v60_v27 }
 0x14d   :  { %v67_v29 = vadd.f32 1e-06, %v63_v28 }
 0x14f   :  { %107 = vrcp.f32 %v67_v29 }
 0x155   :  { %v106_v31 = vpop.eup %105 }
 0x156   :  { %v70_v32 = vmul.f32 %v106_v31, %v68_v30 }
 0x158   :  { %v73_v34 = vmul.f32 %v70_v32, %v38_v6 }
 0x159   :  { %v108_v35 = vpop.eup %107 }
 0x15a   :  { %v72_v36 = vmul.f32 %v108_v35, %v68_v30  ;;  %v76_v37 = vadd.f32 %v75_v33, %v73_v34 }
 0x15c   :  { %v74_v38 = vmul.f32 %v72_v36, %v39_v10  ;;  %78 = vst.msk [vmem:[#allocation8] sm:$0xff] %vm29_vm0, %v76_v37 }
 0x15e   :  { %v77_v39 = vadd.f32 %v75_v33, %v74_v38 }
 0x160   :  { %79 = vst.msk [vmem:[#allocation8 + $0x8] sm:$0xff] %vm29_vm0, %v77_v39 }
 0x161   :  { %142 = shalt.err (!%p139_p12)
}
 0x162   :  { %s143_s5 = scalar_lea.hbm %s226_s3, 256 }
 0x163   :  { %p144_p13 = scmp.ne.s32.totalorder %s226_s3, %s143_s5  ;;  %p147_p0 = scmp.lt.u32.totalorder %s143_s5, %s226_s3 }
 0x165   :  { %p149_p1 = pnand %p147_p0, %p144_p13 }
 0x167   :  { %152 = shalt.err (!%p149_p1)
}
 0x168   :  { %91 = dma.vmem_to_hbm [thread:$0]  %s86_s30, 256, %s226_s3, [#allocation7], %s158_s22, %s158_s22, %s159_s23  }
 0x169   :  { %155 = dma.done.wait [#allocation7], 256  }
 0x16a   :  { %156 = vsyncadd [#allocation7], 4294967040 }
 0x16b   :  { %95 = vsyncpa [#allocation6], 1 }
 0x16c   :  { %96 = vsyncpa [#allocation7], 1 }

</bundles_post_ra>
